<compile_context>
chip_gen: v7x
topology: tpu7x:2x2x1
jax: 0.10.0
libtpu: 0.0.40
codegen_flags: <defaults>
</compile_context>

<pallas_src>
import jax
import jax.numpy as jnp
import numpy as np
from jax.experimental import pallas as pl
from jax.experimental.pallas import tpu as pltpu

_LANE = 128
_SUBLANE = 8


def _round_up(x, m):
    return ((x + m - 1) // m) * m


def f1_kernel(x_ref, w0_ref, b0_ref, w1_ref, b1_ref, out_ref):
    # x is f32 in HBM/VMEM; cast to bf16 in-kernel (VPU cast hides under MXU/DMA).
    x_b = x_ref[...].astype(jnp.bfloat16)

    # Layer 0: (tm, d) @ (d, h_pad) -> (tm, h_pad), f32 accumulation on the MXU.
    h_pre = jnp.dot(x_b, w0_ref[...], preferred_element_type=jnp.float32)
    h_act = jnp.maximum(h_pre + b0_ref[...], 0.0)

    # Layer 1: (tm, h_pad) @ (h_pad, k_pad) -> (tm, k_pad), f32 accumulation.
    out = jnp.dot(h_act.astype(jnp.bfloat16), w1_ref[...],
                  preferred_element_type=jnp.float32) + b1_ref[...]

    # bf16 writeback (lane-dense, half the bytes of f32); upcast happens outside.
    out_ref[...] = out.astype(out_ref.dtype)


def prepare_f1_params(W0, b0, W1, b1):
    """One-time parameter prep: pad h/k to lane multiples, pre-transpose, cast to bf16.

    W0: (h, d), b0: (1, h), W1: (k, h), b1: (1, k)  (all float32, PyTorch layout)
    """
    h, d = W0.shape
    k = W1.shape[0]
    h_pad = _round_up(h, _LANE)   # NOTE: 256 alignment can help v6e/v7x MXU at large h.
    k_pad = _round_up(k, _LANE)

    # Zero-pad hidden units (relu(0)=0 -> no contribution) and classes (sliced
    # off after the kernel), then transpose once so the kernel uses canonical
    # (1,0) contractions with no per-tile weight transpose.
    W0t = jnp.pad(W0, ((0, h_pad - h), (0, 0))).T.astype(jnp.bfloat16)            # (d, h_pad)
    W1t = jnp.pad(W1, ((0, k_pad - k), (0, h_pad - h))).T.astype(jnp.bfloat16)    # (h_pad, k_pad)
    b0p = jnp.pad(b0, ((0, 0), (0, h_pad - h))).astype(jnp.float32)               # (1, h_pad)
    b1p = jnp.pad(b1, ((0, 0), (0, k_pad - k))).astype(jnp.float32)               # (1, k_pad)
    return {"W0t": W0t, "b0p": b0p, "W1t": W1t, "b1p": b1p, "k": k}


def f1_forward(x, params, *, tm=512):
    """Forward pass of F1: relu(x @ W0.T + b0) @ W1.T + b1  -> (n, k) float32."""
    n, d = x.shape
    W0t, b0p = params["W0t"], params["b0p"]
    W1t, b1p = params["W1t"], params["b1p"]
    k = params["k"]
    h_pad = W0t.shape[1]
    k_pad = W1t.shape[1]

    # Batch tile: biggest that fits comfortably; large n naturally gets >=2
    # "parallel" grid steps (megacore / v7x 2-TC sharding).  Small n collapses
    # to a single sublane-aligned tile.  (Prefer multiples of 16 for bf16 rows.)
    if n <= tm:
        tm = max(_SUBLANE, _round_up(n, _SUBLANE))
    grid = (pl.cdiv(n, tm),)

    # Explicit VMEM budget: resident weights + double-buffered x/out tiles +
    # intermediate, with headroom.  Floor at the default scoped limit.
    resident = (W0t.size + W1t.size) * 2 + (b0p.size + b1p.size) * 4
    per_step = 2 * (tm * d * 4 + tm * k_pad * 2)     # double-buffered x (f32) + out (bf16)
    interm = tm * h_pad * 4
    vmem_bytes = int(min(100 << 20, max(32 << 20, 2 * (resident + per_step + interm))))

    out = pl.pallas_call(
        f1_kernel,
        out_shape=jax.ShapeDtypeStruct((n, k_pad), jnp.bfloat16),
        grid=grid,
        in_specs=[
            pl.BlockSpec((tm, d), lambda i: (i, 0)),        # x: streamed per batch tile (f32)
            pl.BlockSpec((d, h_pad), lambda i: (0, 0)),     # W0^T (padded): VMEM-resident
            pl.BlockSpec((1, h_pad), lambda i: (0, 0)),     # b0 (padded): resident
            pl.BlockSpec((h_pad, k_pad), lambda i: (0, 0)), # W1^T (padded): resident
            pl.BlockSpec((1, k_pad), lambda i: (0, 0)),     # b1 (padded): resident
        ],
        out_specs=pl.BlockSpec((tm, k_pad), lambda i: (i, 0)),
        compiler_params=pltpu.CompilerParams(
            dimension_semantics=("parallel",),
            vmem_limit_bytes=vmem_bytes,
        ),
    )(x.astype(jnp.float32), W0t, b0p, W1t, b1p)

    # Slice off class padding and upcast to the module's f32 output in one fused op.
    return out[:, :k].astype(jnp.float32)


if __name__ == "__main__":
    # Shapes consistent with F1(h, d, k): n=8 samples, d=64 features,
    # h=32 hidden units, k=16 classes.
    n, d, h, k = 8, 64, 32, 16

    key = jax.random.PRNGKey(0)
    kx, k0, kb0, k1, kb1 = jax.random.split(key, 5)

    alpha_0 = 1.0 / np.sqrt(d)
    alpha_1 = 1.0 / np.sqrt(h)

    x = jax.random.normal(kx, (n, d), dtype=jnp.float32)
    W0 = jax.random.uniform(k0, (h, d), minval=-alpha_0, maxval=alpha_0,
                            dtype=jnp.float32)
    b0 = jax.random.uniform(kb0, (1, h), minval=-alpha_0, maxval=alpha_0,
                            dtype=jnp.float32)
    W1 = jax.random.uniform(k1, (k, h), minval=-alpha_1, maxval=alpha_1,
                            dtype=jnp.float32)
    b1 = jax.random.uniform(kb1, (1, k), minval=-alpha_1, maxval=alpha_1,
                            dtype=jnp.float32)

    params = prepare_f1_params(W0, b0, W1, b1)   # one-time pad/cast/transpose
    out = f1_forward(x, params)
    out = jax.block_until_ready(out)

    # Pure-JAX f32 reference; loose tolerance because the kernel feeds the MXU
    # bf16 operands and emits a bf16 result (accumulation is still f32).
    ref = jnp.maximum(x @ W0.T + b0, 0.0) @ W1.T + b1
    np.testing.assert_allclose(np.asarray(out), np.asarray(ref),
                               rtol=3e-2, atol=3e-2)

    print("KERNEL_OK")
</pallas_src>

<mosaic_0001>
module attributes {stable_mosaic.version = 11 : i64} {
  func.func @f1_kernel(%arg0: i32, %arg1: memref<8x64xf32, #tpu.memory_space<vmem>>, %arg2: memref<64x128xbf16, #tpu.memory_space<vmem>>, %arg3: memref<1x128xf32, #tpu.memory_space<vmem>>, %arg4: memref<128x128xbf16, #tpu.memory_space<vmem>>, %arg5: memref<1x128xf32, #tpu.memory_space<vmem>>, %arg6: memref<8x128xbf16, #tpu.memory_space<vmem>>) attributes {dimension_semantics = [#tpu.dimension_semantics<parallel>], iteration_bounds = array<i64: 1>, scalar_prefetch = 0 : i64, scratch_operands = 0 : i64, tpu.core_type = #tpu.core_type<tc>, window_params = [{transform_indices = @transform_0, window_bounds = array<i64: 8, 64>}, {pipeline_mode = #tpu.pipeline_mode<synchronous>, transform_indices = @transform_1, window_bounds = array<i64: 64, 128>}, {pipeline_mode = #tpu.pipeline_mode<synchronous>, transform_indices = @transform_2, window_bounds = array<i64: 1, 128>}, {pipeline_mode = #tpu.pipeline_mode<synchronous>, transform_indices = @transform_3, window_bounds = array<i64: 128, 128>}, {pipeline_mode = #tpu.pipeline_mode<synchronous>, transform_indices = @transform_4, window_bounds = array<i64: 1, 128>}, {transform_indices = @transform_5, window_bounds = array<i64: 8, 128>}]} {
    %c0 = arith.constant 0 : index
    %c0_0 = arith.constant 0 : index
    %0 = vector.load %arg1[%c0, %c0_0] : memref<8x64xf32, #tpu.memory_space<vmem>>, vector<8x64xf32>
    %1 = arith.truncf %0 : vector<8x64xf32> to vector<8x64xbf16>
    %c0_1 = arith.constant 0 : index
    %c0_2 = arith.constant 0 : index
    %2 = vector.load %arg2[%c0_1, %c0_2] : memref<64x128xbf16, #tpu.memory_space<vmem>>, vector<64x128xbf16>
    %cst = arith.constant dense<0.000000e+00> : vector<8x128xf32>
    %3 = tpu.matmul %1, %2, %cst {dimension_numbers = #tpu.dot_dimension_numbers<[1], [0], [0], [1], [0, 0, 1, 1], [], []>} : vector<8x64xbf16>, vector<64x128xbf16>, vector<8x128xf32> -> vector<8x128xf32>
    %c0_3 = arith.constant 0 : index
    %c0_4 = arith.constant 0 : index
    %4 = vector.load %arg3[%c0_3, %c0_4] : memref<1x128xf32, #tpu.memory_space<vmem>>, vector<1x128xf32>
    %5 = vector.broadcast %4 : vector<1x128xf32> to vector<8x128xf32>
    %6 = arith.addf %3, %5 : vector<8x128xf32>
    %cst_5 = arith.constant 0.000000e+00 : f32
    %7 = vector.broadcast %cst_5 : f32 to vector<8x128xf32>
    %8 = arith.maximumf %6, %7 : vector<8x128xf32>
    %9 = arith.truncf %8 : vector<8x128xf32> to vector<8x128xbf16>
    %c0_6 = arith.constant 0 : index
    %c0_7 = arith.constant 0 : index
    %10 = vector.load %arg4[%c0_6, %c0_7] : memref<128x128xbf16, #tpu.memory_space<vmem>>, vector<128x128xbf16>
    %cst_8 = arith.constant dense<0.000000e+00> : vector<8x128xf32>
    %11 = tpu.matmul %9, %10, %cst_8 {dimension_numbers = #tpu.dot_dimension_numbers<[1], [0], [0], [1], [0, 0, 1, 1], [], []>} : vector<8x128xbf16>, vector<128x128xbf16>, vector<8x128xf32> -> vector<8x128xf32>
    %c0_9 = arith.constant 0 : index
    %c0_10 = arith.constant 0 : index
    %12 = vector.load %arg5[%c0_9, %c0_10] : memref<1x128xf32, #tpu.memory_space<vmem>>, vector<1x128xf32>
    %13 = vector.broadcast %12 : vector<1x128xf32> to vector<8x128xf32>
    %14 = arith.addf %11, %13 : vector<8x128xf32>
    %15 = arith.truncf %14 : vector<8x128xf32> to vector<8x128xbf16>
    %c0_11 = arith.constant 0 : index
    %c0_12 = arith.constant 0 : index
    %16 = vector.load %arg6[%c0_11, %c0_12] : memref<8x128xbf16, #tpu.memory_space<vmem>>, vector<8x128xbf16>
    tpu.vector_store %arg6[%c0_11, %c0_12], %15 {strides = array<i32>} : memref<8x128xbf16, #tpu.memory_space<vmem>>, vector<8x128xbf16>,
    return
  }
  func.func @transform_0(%arg0: i32) -> (i32, i32) {
    %c0_i32 = arith.constant 0 : i32
    %c0_i32_0 = arith.constant 0 : i32
    return %arg0, %c0_i32 : i32, i32
  }
  func.func @transform_1(%arg0: i32) -> (i32, i32) {
    %c0_i32 = arith.constant 0 : i32
    %c0_i32_0 = arith.constant 0 : i32
    %c0_i32_1 = arith.constant 0 : i32
    return %c0_i32, %c0_i32_0 : i32, i32
  }
  func.func @transform_2(%arg0: i32) -> (i32, i32) {
    %c0_i32 = arith.constant 0 : i32
    %c0_i32_0 = arith.constant 0 : i32
    %c0_i32_1 = arith.constant 0 : i32
    return %c0_i32, %c0_i32_0 : i32, i32
  }
  func.func @transform_3(%arg0: i32) -> (i32, i32) {
    %c0_i32 = arith.constant 0 : i32
    %c0_i32_0 = arith.constant 0 : i32
    %c0_i32_1 = arith.constant 0 : i32
    return %c0_i32, %c0_i32_0 : i32, i32
  }
  func.func @transform_4(%arg0: i32) -> (i32, i32) {
    %c0_i32 = arith.constant 0 : i32
    %c0_i32_0 = arith.constant 0 : i32
    %c0_i32_1 = arith.constant 0 : i32
    return %c0_i32, %c0_i32_0 : i32, i32
  }
  func.func @transform_5(%arg0: i32) -> (i32, i32) {
    %c0_i32 = arith.constant 0 : i32
    %c0_i32_0 = arith.constant 0 : i32
    return %arg0, %c0_i32 : i32, i32
  }
}

</mosaic_0001>

<bundles_post_ra>
// kernel: tpu_custom_call.1
= control target key start
LH: loop header
LB: loop body
LE: loop exit
PB: predicated region body
PF: predicated region fallthrough
CT: control target
= control target key end

     0   :  { %10 = vsyncpa [#allocation3], 0  ;;  %s550_s0 = inlined_call_operand.hbm [shape: f32[8,64], index: 0, kind: input, shape index: {}]   ;;  %s551_s1 = inlined_call_operand.hbm [shape: bf16[64,128], index: 1, kind: input, shape index: {}]   ;;  %s552_s2 = inlined_call_operand.vmem [shape: f32[1,128], index: 2, kind: input, shape index: {}]   ;;  %s553_s3 = inlined_call_operand.hbm [shape: bf16[128,128], index: 3, kind: input, shape index: {}]   ;;  %s554_s4 = inlined_call_operand.vmem [shape: f32[1,128], index: 4, kind: input, shape index: {}]   ;;  %s555_s5 = inlined_call_operand.hbm [shape: bf16[8,128], index: 5, kind: output, shape index: {}]  }
   0x1   :  { %11 = vsyncpa [#allocation6], 0 }
   0x2   :  { %12 = vsyncpa [#allocation4], 0  ;;  %s452_s18 = smov [#allocation5]   ;;  %s358_s22 = scalar_lea.hbm %s551_s1, 512 }
   0x3   :  { %s28_s19 = sshll.u32 %s452_s18, 4  ;;  %p359_p0 = scmp.ne.s32.totalorder %s551_s1, %s358_s22  ;;  %s29_s19 = int_to_ptr.vmem [resolvable:$true] %s28_s19 }
   0x4   :  { %p362_p1 = scmp.lt.u32.totalorder %s358_s22, %s551_s1 }
   0x6   :  { %p364_p2 = pnand %p362_p1, %p359_p0 }
   0x8   :  { %367 = shalt.err (!%p364_p2)
}
   0x9   :  { %s368_s27 = scalar_lea.vmem %s29_s19, 512  ;;  %p373_p4 = scmp.lt.s32.totalorder %s29_s19, %s29_s19 }
   0xa   :  { %p369_p3 = scmp.ne.s32.totalorder %s29_s19, %s368_s27  ;;  %p374_p5 = scmp.lt.s32.totalorder %s368_s27, %s368_s27 }
   0xc   :  { %p375_p6 = por %p374_p5, %p373_p4 }
   0xe   :  { %p376_p7 = pnand %p375_p6, %p369_p3 }
  0x10   :  { %379 = shalt.err (!%p376_p7)
}
  0x11   :  { %s453_s28 = smov 64   ;;  %s454_s29 = smov 4  }
  0x12   :  { %34 = dma.hbm_to_vmem [thread:$0]  %s551_s1, 512, %s29_s19, [#allocation6], %s453_s28, %s453_s28, %s454_s29  }
  0x13   :  { %s455_s7 = smov [#allocation2]   ;;  %s456_s9 = smov [#allocation7]  }
  0x14   :  { %s19_s8 = sshll.u32 %s455_s7, 4  ;;  %s42_s10 = sshll.u32 %s456_s9, 4  ;;  %s20_s8 = int_to_ptr.vmem [resolvable:$true] %s19_s8  ;;  %s43_s10 = int_to_ptr.vmem [resolvable:$true] %s42_s10 }
  0x15   :  { %s380_s13 = scalar_lea.hbm %s550_s0, 128 }
  0x16   :  { %p381_p8 = scmp.ne.s32.totalorder %s550_s0, %s380_s13  ;;  %p384_p9 = scmp.lt.u32.totalorder %s380_s13, %s550_s0 }
  0x18   :  { %p386_p10 = pnand %p384_p9, %p381_p8 }
  0x1a   :  { %389 = shalt.err (!%p386_p10)
}
  0x1b   :  { %s390_s1 = scalar_lea.vmem %s20_s8, 128  ;;  %p395_p12 = scmp.lt.s32.totalorder %s20_s8, %s20_s8 }
  0x1c   :  { %p391_p11 = scmp.ne.s32.totalorder %s20_s8, %s390_s1  ;;  %p396_p13 = scmp.lt.s32.totalorder %s390_s1, %s390_s1 }
  0x1e   :  { %p397_p0 = por %p396_p13, %p395_p12 }
  0x20   :  { %p398_p1 = pnand %p397_p0, %p391_p11 }
  0x22   :  { %401 = shalt.err (!%p398_p1)
}
  0x23   :  { %22 = dma.hbm_to_vmem [thread:$0]  %s550_s0, 128, %s20_s8, [#allocation3]  }
  0x24   :  { %s402_s22 = scalar_lea.hbm %s553_s3, 1024 }
  0x25   :  { %p403_p2 = scmp.ne.s32.totalorder %s553_s3, %s402_s22  ;;  %p406_p3 = scmp.lt.u32.totalorder %s402_s22, %s553_s3 }
  0x27   :  { %p408_p4 = pnand %p406_p3, %p403_p2 }
  0x29   :  { %411 = shalt.err (!%p408_p4)
}
  0x2a   :  { %s412_s27 = scalar_lea.vmem %s43_s10, 1024  ;;  %p417_p6 = scmp.lt.s32.totalorder %s43_s10, %s43_s10 }
  0x2b   :  { %p413_p5 = scmp.ne.s32.totalorder %s43_s10, %s412_s27  ;;  %p418_p7 = scmp.lt.s32.totalorder %s412_s27, %s412_s27 }
  0x2d   :  { %p419_p8 = por %p418_p7, %p417_p6 }
  0x2f   :  { %p420_p9 = pnand %p419_p8, %p413_p5 }
  0x31   :  { %423 = shalt.err (!%p420_p9)
}
  0x32   :  { %48 = dma.hbm_to_vmem [thread:$0]  %s553_s3, 1024, %s43_s10, [#allocation6], %s453_s28, %s453_s28, %s454_s29  }
  0x33   :  { %446 = dma.done.wait [#allocation3], 128  }
  0x34   :  { %447 = vsyncadd [#allocation3], 4294967168 }
  0x35   :  { %448 = dma.done.wait [#allocation6], 1536  }
  0x36   :  { %449 = vsyncadd [#allocation6], 4294965760  ;;  %v457_v0 = vmov 0.0   ;;  %vm458_vm0 = vmmov 0   ;;  %v346_v1 = vld [vmem:[#allocation5] sm:$0xff]   ;;  %v347_v2 = vld [vmem:[#allocation5 + $0x8] sm:$0xff]  }
  0x37   :  { %306 = vmatprep.subr.bf16.mxu0 %v457_v0  ;;  %314 = vmatprep.mubr.msk.bf16.mxu0 %vm458_vm0, %v457_v0  ;;  %v350_v3 = vld [vmem:[#allocation7] sm:$0xff]   ;;  %v348_v4 = vld [vmem:[#allocation5 + $0x10] sm:$0xff]   ;;  %v351_v5 = vld [vmem:[#allocation7 + $0x8] sm:$0xff]   ;;  %vm102_vm1 = vcmask 523264   ;;  %s459_s7 = smov [#allocation8]  }
  0x38   :  { %318 = vmatprep.subr.bf16.mxu1 %v457_v0  ;;  %334 = vmatprep.mubr.msk.bf16.mxu1 %vm458_vm0, %v457_v0  ;;  %v349_v6 = vld [vmem:[#allocation5 + $0x18] sm:$0xff]   ;;  %v352_v8 = vld [vmem:[#allocation7 + $0x10] sm:$0xff]   ;;  %v354_v11 = vld [vmem:[#allocation7 + $0x20] sm:$0xff]   ;;  %s267_s8 = sshll.u32 %s459_s7, 4  ;;  %s268_s8 = int_to_ptr.vmem [resolvable:$true] %s267_s8 }
  0x39   :  { %307 = vmatpush3.bf16.msra.mxu0 %v346_v1  ;;  %319 = vmatpush3.bf16.msra.mxu1 %v350_v3  ;;  %v61_v7 = vld [vmem:[#allocation2] sm:$0xff]  ;;  %v355_v12 = vld [vmem:[#allocation7 + $0x28] sm:$0xff]   ;;  %v356_v13 = vld [vmem:[#allocation7 + $0x30] sm:$0xff]   ;;  %p429_p11 = scmp.lt.s32.totalorder %s268_s8, %s268_s8 }
  0x3a   :  { %308 = vmatprep.subr.bf16.mxu0 %v457_v0  ;;  %320 = vmatprep.subr.bf16.mxu1 %v457_v0  ;;  %v62_v9 = vpack.c.bf16 %v61_v7, %v61_v7  ;;  %v353_v10 = vld [vmem:[#allocation7 + $0x18] sm:$0xff]  }
  0x3b   :  { %v357_v14 = vld [vmem:[#allocation7 + $0x38] sm:$0xff]  }
  0x3c   :  { %v277_v15 = vld [vmem:[%s552_s2] ss:$0 sm:$0xff]  ;;  %s424_s2 = scalar_lea.vmem %s268_s8, 64 }
  0x3d   :  { %309 = vmatpush3.bf16.msra.mxu0 %v347_v2  ;;  %321 = vmatpush3.bf16.msra.mxu1 %v351_v5  ;;  %v283_v23 = vld [vmem:[%s554_s4] ss:$0 sm:$0xff]  ;;  %p425_p10 = scmp.ne.s32.totalorder %s268_s8, %s424_s2  ;;  %p430_p12 = scmp.lt.s32.totalorder %s424_s2, %s424_s2 }
  0x3e   :  { %310 = vmatprep.subr.bf16.mxu0 %v457_v0  ;;  %322 = vmatprep.subr.bf16.mxu1 %v457_v0 }
  0x3f   :  { %p431_p13 = por %p430_p12, %p429_p11 }
  0x41   :  { %311 = vmatpush3.bf16.msra.mxu0 %v348_v4  ;;  %323 = vmatpush3.bf16.msra.mxu1 %v352_v8  ;;  %p432_p0 = pnand %p431_p13, %p425_p10 }
  0x42   :  { %312 = vmatprep.subr.bf16.mxu0 %v457_v0  ;;  %324 = vmatprep.subr.bf16.mxu1 %v457_v0 }
  0x45   :  { %313 = vmatpush3.bf16.msra.mxu0 %v349_v6  ;;  %325 = vmatpush3.bf16.msra.mxu1 %v353_v10 }
  0x46   :  { %326 = vmatprep.subr.bf16.mxu1 %v457_v0 }
  0x48   :  { %315 = vmatmul.mubr.msk.bf16.vlgmr.msra.gmra.mrb[0].mxu0 %vm102_vm1, %v62_v9 }
  0x49   :  { %327 = vmatpush3.bf16.msra.mxu1 %v354_v11 }
  0x4a   :  { %328 = vmatprep.subr.bf16.mxu1 %v457_v0 }
  0x4d   :  { %329 = vmatpush3.bf16.msra.mxu1 %v355_v12 }
  0x4e   :  { %330 = vmatprep.subr.bf16.mxu1 %v457_v0 }
  0x51   :  { %331 = vmatpush3.bf16.msra.mxu1 %v356_v13 }
  0x52   :  { %332 = vmatprep.subr.bf16.mxu1 %v457_v0 }
  0x55   :  { %333 = vmatpush3.bf16.msra.mxu1 %v357_v14 }
 0x11b   :  { %v140_v16 = vpop.f32.mrb[0].mxu0 }
 0x11c   :  { %v141_v17 = vadd.f32 %v277_v15, %v140_v16  ;;  %v316_v18 = vpop.f32.mrb[1].mxu0 }
 0x11d   :  { %v143_v19 = vpop.f32.mrb[2].mxu0 }
 0x11e   :  { %v146_v20 = vmax.f32 %v141_v17, 0.0  ;;  %v317_v21 = vpop.f32.mrb[3].mxu0 }
 0x120   :  { %v147_v22 = vpack.c.bf16 %v146_v20, %v146_v20 }
 0x122   :  { %335 = vmatmul.mubr.bf16.vlgmr.msra.gmra.mrb[0].mxu1 %v147_v22 }
 0x1f5   :  { %v253_v24 = vpop.f32.mrb[0].mxu1 }
 0x1f6   :  { %v254_v25 = vadd.f32 %v283_v23, %v253_v24  ;;  %v336_v26 = vpop.f32.mrb[1].mxu1 }
 0x1f7   :  { %v256_v27 = vpop.f32.mrb[2].mxu1 }
 0x1f8   :  { %v259_v28 = vpack.c.bf16 %v254_v25, %v254_v25  ;;  %v337_v29 = vpop.f32.mrb[3].mxu1 }
 0x1fa   :  { %260 = vst [vmem:[#allocation8] sm:$0xf] %v259_v28 }
 0x1fb   :  { %435 = shalt.err (!%p432_p0)
}
 0x1fc   :  { %s436_s4 = scalar_lea.hbm %s555_s5, 64 }
 0x1fd   :  { %p437_p1 = scmp.ne.s32.totalorder %s555_s5, %s436_s4  ;;  %p440_p2 = scmp.lt.u32.totalorder %s436_s4, %s555_s5 }
 0x1ff   :  { %p442_p3 = pnand %p440_p2, %p437_p1 }
 0x201   :  { %445 = shalt.err (!%p442_p3)
}
 0x202   :  { %270 = dma.vmem_to_hbm [thread:$0]  %s268_s8, 64, %s555_s5, [#allocation4]  }
 0x203   :  { %450 = dma.done.wait [#allocation4], 64  }
 0x204   :  { %451 = vsyncadd [#allocation4], 4294967232 }
 0x205   :  { %274 = vsyncpa [#allocation3], 1 }
 0x206   :  { %275 = vsyncpa [#allocation6], 1 }
 0x207   :  { %276 = vsyncpa [#allocation4], 1 }

</bundles_post_ra>
